<compile_context>
chip_gen: v7x
topology: tpu7x:2x2x1
jax: 0.10.0
libtpu: 0.0.40
codegen_flags: <defaults>
</compile_context>

<pallas_src>
import functools

import jax
import jax.numpy as jnp
from jax import lax
from jax.experimental import pallas as pl
from jax.experimental.pallas import tpu as pltpu

GAMMA = 2.0   # module hard-codes 2.0 -> explicit square in the kernel
ALPHA = 0.25

_LANES = 128
_SUBLANES = 8
_CHUNK = 32                 # rows per unrolled chunk (4 f32 vregs)
_UNROLL = 4
_STEP = _CHUNK * _UNROLL    # 128 rows per fori iteration; tiles are multiples of this


def _focal_loss_kernel(pred_ref, out_ref, *, tile_rows):
    # pred_ref: (tile_rows, 128) sign-encoded probabilities (f32 or bf16)
    # out_ref:  (8, 128) f32 per-tile partial sum
    def chunk_loss(row0):
        enc = pred_ref[pl.ds(row0, _CHUNK), :].astype(jnp.float32)
        # Sign bit of the float == sign bit of its int32 view; catches -0.0
        # exactly (a plain `enc < 0` would miss a target with pred == 0.0).
        is_tgt = pltpu.bitcast(enc, jnp.int32) < 0
        p = jnp.abs(enc)
        pt = jnp.where(is_tgt, p, 1.0 - p)
        coef = jnp.where(is_tgt, -ALPHA, ALPHA - 1.0)   # folds -w into one select
        one_m_pt = 1.0 - pt
        # gamma == 2.0 -> explicit square (VALU), not jnp.power (EUP exp/log).
        # NOTE: log(pt) intentionally unguarded, matching the PyTorch module.
        return coef * (one_m_pt * one_m_pt) * jnp.log(pt)

    def body(s, acc):
        base = pl.multiple_of(s * _STEP, _STEP)
        for u in range(_UNROLL):                        # manual 4x unroll
            off = pl.multiple_of(base + u * _CHUNK, _CHUNK)
            acc = acc + chunk_loss(off)
        return acc

    acc = lax.fori_loop(0, tile_rows // _STEP, body,
                        jnp.zeros((_CHUNK, _LANES), jnp.float32))
    # (32,128) -> (8,128): vreg-aligned VALU tree, no cross-lane XLU reduce.
    out_ref[...] = (acc[0:8, :] + acc[8:16, :]) + (acc[16:24, :] + acc[24:32, :])


def _round_up(x, m):
    return (x + m - 1) // m * m


def cls_loss(cls_map_pred, cls_map_gt, *, tile_rows=4096):
    """Summed focal loss (gamma=2, alpha=0.25).

    cls_map_pred: (n, n_classes) probabilities (f32 or bf16)
    cls_map_gt:   (n,) integer class labels
    """
    n, n_classes = cls_map_pred.shape

    dt = cls_map_pred.dtype
    if dt == jnp.float32:
        int_dt, sign_val = jnp.int32, -(1 << 31)
    elif dt == jnp.bfloat16:
        int_dt, sign_val = jnp.int16, -(1 << 15)
    else:
        cls_map_pred = cls_map_pred.astype(jnp.float32)
        dt, int_dt, sign_val = jnp.float32, jnp.int32, -(1 << 31)

    # One-hot target mask, flattened row-major exactly like pred.
    # NOTE: out-of-range labels give an all-zero row ("no target") instead of
    # erroring like torch.nn.functional.one_hot would.
    cls_ids = jnp.arange(n_classes, dtype=jnp.int32)[None, :]
    mask = (cls_map_gt.astype(jnp.int32)[:, None] == cls_ids).reshape(-1)

    # Sign-bit encode target-ness into pred itself (bitwise OR keeps -0.0 for
    # pred == 0.0 targets).  This + the optional pad below is one fused XLA
    # elementwise/pad pass over pred; no separate mask array reaches the kernel.
    bits = lax.bitcast_convert_type(cls_map_pred.reshape(-1), int_dt)
    enc_bits = jnp.where(mask, bits | jnp.array(sign_val, dtype=int_dt), bits)
    enc = lax.bitcast_convert_type(enc_bits, dt)

    total = n * n_classes
    rows_needed = pl.cdiv(total, _LANES)

    # Tile sizing: 1-4 MiB blocks amortize per-grid-step overhead; cap so
    # num_tiles >= 4 on large inputs (>= 2 steps per v7x TensorCore on the
    # "parallel" grid axis).  At tile_rows=4096 f32 the double-buffered VMEM
    # footprint is ~4 MiB - well under the scoped default on v5e/v6e/v7x.
    tile = _round_up(min(tile_rows, max(rows_needed, _STEP)), _STEP)
    if rows_needed >= 4 * 512:
        tile = min(tile, _round_up(pl.cdiv(rows_needed, 4), _STEP))
    num_tiles = pl.cdiv(rows_needed, tile)
    rows = num_tiles * tile

    pad = rows * _LANES - total
    if pad:  # padding is +0.0 / non-target -> pt=1, (1-pt)^2=0, log(1)=0 -> adds 0
        enc = jnp.pad(enc, (0, pad))
    enc2d = enc.reshape(rows, _LANES)

    kernel = functools.partial(_focal_loss_kernel, tile_rows=tile)

    cost = pl.CostEstimate(
        flops=8 * rows * _LANES,
        transcendentals=rows * _LANES,
        bytes_accessed=rows * _LANES * enc2d.dtype.itemsize
        + num_tiles * _SUBLANES * _LANES * 4,
    )

    partials = pl.pallas_call(
        kernel,
        out_shape=jax.ShapeDtypeStruct((num_tiles * _SUBLANES, _LANES), jnp.float32),
        grid=(num_tiles,),
        in_specs=[pl.BlockSpec((tile, _LANES), lambda i: (i, 0))],
        out_specs=pl.BlockSpec((_SUBLANES, _LANES), lambda i: (i, 0)),
        compiler_params=pltpu.CompilerParams(
            dimension_semantics=("parallel",)),
        cost_estimate=cost,
    )(enc2d)

    # Tiny final reduction over num_tiles * 1024 lane-dense partials.
    return jnp.sum(partials)


if __name__ == "__main__":
    key = jax.random.PRNGKey(0)
    k_pred, k_gt = jax.random.split(key)

    n, n_classes = 128, 8
    # predictions are probabilities in (0, 1) (as the module's pt.log() implies)
    logits = jax.random.normal(k_pred, (n, n_classes), dtype=jnp.float32)
    cls_map_pred = jax.nn.sigmoid(logits)
    cls_map_gt = jax.random.randint(k_gt, (n,), 0, n_classes, dtype=jnp.int32)

    loss = cls_loss(cls_map_pred, cls_map_gt)
    loss = jax.block_until_ready(loss)

    # sanity check against a pure-JAX reference of the same math as the module
    onehot = jax.nn.one_hot(cls_map_gt, n_classes, dtype=jnp.float32)
    pt = cls_map_pred * onehot + (1.0 - cls_map_pred) * (1.0 - onehot)
    w = ALPHA * onehot + (1.0 - ALPHA) * (1.0 - onehot)
    ref = jnp.sum(-w * jnp.power(1.0 - pt, GAMMA) * jnp.log(pt))
    assert jnp.allclose(loss, ref, rtol=1e-4, atol=1e-3), (loss, ref)

    print("KERNEL_OK")
</pallas_src>

<mosaic_0001>
module attributes {stable_mosaic.version = 11 : i64} {
  func.func @_focal_loss_kernel(%arg0: i32, %arg1: memref<128x128xf32, #tpu.memory_space<vmem>>, %arg2: memref<8x128xf32, #tpu.memory_space<vmem>>) attributes {dimension_semantics = [#tpu.dimension_semantics<parallel>], iteration_bounds = array<i64: 1>, scalar_prefetch = 0 : i64, scratch_operands = 0 : i64, tpu.core_type = #tpu.core_type<tc>, window_params = [{transform_indices = @transform_0, window_bounds = array<i64: 128, 128>}, {transform_indices = @transform_1, window_bounds = array<i64: 8, 128>}]} {
    %cst = arith.constant 0.000000e+00 : f32
    %0 = vector.broadcast %cst : f32 to vector<32x128xf32>
    %c0_i32 = arith.constant 0 : i32
    %c128_i32 = arith.constant 128 : i32
    %1 = arith.muli %c0_i32, %c128_i32 : i32
    %2 = tpu.assume_multiple %1, 128 : i32
    %c0_i32_0 = arith.constant 0 : i32
    %3 = arith.addi %2, %c0_i32_0 : i32
    %4 = tpu.assume_multiple %3, 32 : i32
    %5 = arith.index_cast %4 : i32 to index
    %c0 = arith.constant 0 : index
    %6 = vector.load %arg1[%5, %c0] : memref<128x128xf32, #tpu.memory_space<vmem>>, vector<32x128xf32>
    %7 = tpu.bitcast %6 : vector<32x128xf32> -> vector<32x128xi32>
    %c0_i32_1 = arith.constant 0 : i32
    %8 = vector.broadcast %c0_i32_1 : i32 to vector<32x128xi32>
    %9 = arith.cmpi slt, %7, %8 : vector<32x128xi32>
    %10 = math.absf %6 : vector<32x128xf32>
    %cst_2 = arith.constant 1.000000e+00 : f32
    %11 = vector.broadcast %cst_2 : f32 to vector<32x128xf32>
    %12 = arith.subf %11, %10 : vector<32x128xf32>
    %13 = arith.select %9, %10, %12 : vector<32x128xi1>, vector<32x128xf32>
    %cst_3 = arith.constant -2.500000e-01 : f32
    %cst_4 = arith.constant -7.500000e-01 : f32
    %14 = vector.broadcast %cst_3 : f32 to vector<32x128xf32>
    %15 = vector.broadcast %cst_4 : f32 to vector<32x128xf32>
    %16 = arith.select %9, %14, %15 : vector<32x128xi1>, vector<32x128xf32>
    %cst_5 = arith.constant 1.000000e+00 : f32
    %17 = vector.broadcast %cst_5 : f32 to vector<32x128xf32>
    %18 = arith.subf %17, %13 : vector<32x128xf32>
    %19 = arith.mulf %18, %18 : vector<32x128xf32>
    %20 = arith.mulf %16, %19 : vector<32x128xf32>
    %21 = math.log %13 : vector<32x128xf32>
    %22 = arith.mulf %20, %21 : vector<32x128xf32>
    %23 = arith.addf %0, %22 : vector<32x128xf32>
    %c32_i32 = arith.constant 32 : i32
    %24 = arith.addi %2, %c32_i32 : i32
    %25 = tpu.assume_multiple %24, 32 : i32
    %26 = arith.index_cast %25 : i32 to index
    %c0_6 = arith.constant 0 : index
    %27 = vector.load %arg1[%26, %c0_6] : memref<128x128xf32, #tpu.memory_space<vmem>>, vector<32x128xf32>
    %28 = tpu.bitcast %27 : vector<32x128xf32> -> vector<32x128xi32>
    %c0_i32_7 = arith.constant 0 : i32
    %29 = vector.broadcast %c0_i32_7 : i32 to vector<32x128xi32>
    %30 = arith.cmpi slt, %28, %29 : vector<32x128xi32>
    %31 = math.absf %27 : vector<32x128xf32>
    %cst_8 = arith.constant 1.000000e+00 : f32
    %32 = vector.broadcast %cst_8 : f32 to vector<32x128xf32>
    %33 = arith.subf %32, %31 : vector<32x128xf32>
    %34 = arith.select %30, %31, %33 : vector<32x128xi1>, vector<32x128xf32>
    %cst_9 = arith.constant -2.500000e-01 : f32
    %cst_10 = arith.constant -7.500000e-01 : f32
    %35 = vector.broadcast %cst_9 : f32 to vector<32x128xf32>
    %36 = vector.broadcast %cst_10 : f32 to vector<32x128xf32>
    %37 = arith.select %30, %35, %36 : vector<32x128xi1>, vector<32x128xf32>
    %cst_11 = arith.constant 1.000000e+00 : f32
    %38 = vector.broadcast %cst_11 : f32 to vector<32x128xf32>
    %39 = arith.subf %38, %34 : vector<32x128xf32>
    %40 = arith.mulf %39, %39 : vector<32x128xf32>
    %41 = arith.mulf %37, %40 : vector<32x128xf32>
    %42 = math.log %34 : vector<32x128xf32>
    %43 = arith.mulf %41, %42 : vector<32x128xf32>
    %44 = arith.addf %23, %43 : vector<32x128xf32>
    %c64_i32 = arith.constant 64 : i32
    %45 = arith.addi %2, %c64_i32 : i32
    %46 = tpu.assume_multiple %45, 32 : i32
    %47 = arith.index_cast %46 : i32 to index
    %c0_12 = arith.constant 0 : index
    %48 = vector.load %arg1[%47, %c0_12] : memref<128x128xf32, #tpu.memory_space<vmem>>, vector<32x128xf32>
    %49 = tpu.bitcast %48 : vector<32x128xf32> -> vector<32x128xi32>
    %c0_i32_13 = arith.constant 0 : i32
    %50 = vector.broadcast %c0_i32_13 : i32 to vector<32x128xi32>
    %51 = arith.cmpi slt, %49, %50 : vector<32x128xi32>
    %52 = math.absf %48 : vector<32x128xf32>
    %cst_14 = arith.constant 1.000000e+00 : f32
    %53 = vector.broadcast %cst_14 : f32 to vector<32x128xf32>
    %54 = arith.subf %53, %52 : vector<32x128xf32>
    %55 = arith.select %51, %52, %54 : vector<32x128xi1>, vector<32x128xf32>
    %cst_15 = arith.constant -2.500000e-01 : f32
    %cst_16 = arith.constant -7.500000e-01 : f32
    %56 = vector.broadcast %cst_15 : f32 to vector<32x128xf32>
    %57 = vector.broadcast %cst_16 : f32 to vector<32x128xf32>
    %58 = arith.select %51, %56, %57 : vector<32x128xi1>, vector<32x128xf32>
    %cst_17 = arith.constant 1.000000e+00 : f32
    %59 = vector.broadcast %cst_17 : f32 to vector<32x128xf32>
    %60 = arith.subf %59, %55 : vector<32x128xf32>
    %61 = arith.mulf %60, %60 : vector<32x128xf32>
    %62 = arith.mulf %58, %61 : vector<32x128xf32>
    %63 = math.log %55 : vector<32x128xf32>
    %64 = arith.mulf %62, %63 : vector<32x128xf32>
    %65 = arith.addf %44, %64 : vector<32x128xf32>
    %c96_i32 = arith.constant 96 : i32
    %66 = arith.addi %2, %c96_i32 : i32
    %67 = tpu.assume_multiple %66, 32 : i32
    %68 = arith.index_cast %67 : i32 to index
    %c0_18 = arith.constant 0 : index
    %69 = vector.load %arg1[%68, %c0_18] : memref<128x128xf32, #tpu.memory_space<vmem>>, vector<32x128xf32>
    %70 = tpu.bitcast %69 : vector<32x128xf32> -> vector<32x128xi32>
    %c0_i32_19 = arith.constant 0 : i32
    %71 = vector.broadcast %c0_i32_19 : i32 to vector<32x128xi32>
    %72 = arith.cmpi slt, %70, %71 : vector<32x128xi32>
    %73 = math.absf %69 : vector<32x128xf32>
    %cst_20 = arith.constant 1.000000e+00 : f32
    %74 = vector.broadcast %cst_20 : f32 to vector<32x128xf32>
    %75 = arith.subf %74, %73 : vector<32x128xf32>
    %76 = arith.select %72, %73, %75 : vector<32x128xi1>, vector<32x128xf32>
    %cst_21 = arith.constant -2.500000e-01 : f32
    %cst_22 = arith.constant -7.500000e-01 : f32
    %77 = vector.broadcast %cst_21 : f32 to vector<32x128xf32>
    %78 = vector.broadcast %cst_22 : f32 to vector<32x128xf32>
    %79 = arith.select %72, %77, %78 : vector<32x128xi1>, vector<32x128xf32>
    %cst_23 = arith.constant 1.000000e+00 : f32
    %80 = vector.broadcast %cst_23 : f32 to vector<32x128xf32>
    %81 = arith.subf %80, %76 : vector<32x128xf32>
    %82 = arith.mulf %81, %81 : vector<32x128xf32>
    %83 = arith.mulf %79, %82 : vector<32x128xf32>
    %84 = math.log %76 : vector<32x128xf32>
    %85 = arith.mulf %83, %84 : vector<32x128xf32>
    %86 = arith.addf %65, %85 : vector<32x128xf32>
    %c1_i32 = arith.constant 1 : i32
    %87 = vector.extract_strided_slice %86 {offsets = [0, 0], sizes = [8, 128], strides = [1, 1]} : vector<32x128xf32> to vector<8x128xf32>
    %88 = vector.extract_strided_slice %86 {offsets = [8, 0], sizes = [8, 128], strides = [1, 1]} : vector<32x128xf32> to vector<8x128xf32>
    %89 = arith.addf %87, %88 : vector<8x128xf32>
    %90 = vector.extract_strided_slice %86 {offsets = [16, 0], sizes = [8, 128], strides = [1, 1]} : vector<32x128xf32> to vector<8x128xf32>
    %91 = vector.extract_strided_slice %86 {offsets = [24, 0], sizes = [8, 128], strides = [1, 1]} : vector<32x128xf32> to vector<8x128xf32>
    %92 = arith.addf %90, %91 : vector<8x128xf32>
    %93 = arith.addf %89, %92 : vector<8x128xf32>
    %c0_24 = arith.constant 0 : index
    %c0_25 = arith.constant 0 : index
    %94 = vector.load %arg2[%c0_24, %c0_25] : memref<8x128xf32, #tpu.memory_space<vmem>>, vector<8x128xf32>
    tpu.vector_store %arg2[%c0_24, %c0_25], %93 {strides = array<i32>} : memref<8x128xf32, #tpu.memory_space<vmem>>, vector<8x128xf32>,
    return
  }
  func.func @transform_0(%arg0: i32) -> (i32, i32) {
    %c0_i32 = arith.constant 0 : i32
    %c0_i32_0 = arith.constant 0 : i32
    return %arg0, %c0_i32 : i32, i32
  }
  func.func @transform_1(%arg0: i32) -> (i32, i32) {
    %c0_i32 = arith.constant 0 : i32
    %c0_i32_0 = arith.constant 0 : i32
    return %arg0, %c0_i32 : i32, i32
  }
}

</mosaic_0001>

<bundles_post_ra>
// kernel: tpu_custom_call.1
= control target key start
LH: loop header
LB: loop body
LE: loop exit
PB: predicated region body
PF: predicated region fallthrough
CT: control target
= control target key end

     0   :  { %6 = vsyncpa [#allocation3], 0  ;;  %s503_s0 = inlined_call_operand.hbm [shape: f32[128,128], index: 0, kind: input, shape index: {}]   ;;  %s504_s1 = inlined_call_operand.hbm [shape: f32[8,128], index: 1, kind: output, shape index: {}]  }
   0x1   :  { %7 = vsyncpa [#allocation4], 0  ;;  %s360_s6 = smov [#allocation2]   ;;  %s312_s10 = scalar_lea.hbm %s503_s0, 2048 }
   0x2   :  { %s13_s7 = sshll.u32 %s360_s6, 4  ;;  %p313_p0 = scmp.ne.s32.totalorder %s503_s0, %s312_s10  ;;  %s14_s7 = int_to_ptr.vmem [resolvable:$true] %s13_s7 }
   0x3   :  { %p316_p1 = scmp.lt.u32.totalorder %s312_s10, %s503_s0 }
   0x5   :  { %p318_p2 = pnand %p316_p1, %p313_p0 }
   0x7   :  { %321 = shalt.err (!%p318_p2)
}
   0x8   :  { %s322_s15 = scalar_lea.vmem %s14_s7, 2048  ;;  %p327_p4 = scmp.lt.s32.totalorder %s14_s7, %s14_s7 }
   0x9   :  { %p323_p3 = scmp.ne.s32.totalorder %s14_s7, %s322_s15  ;;  %p328_p5 = scmp.lt.s32.totalorder %s322_s15, %s322_s15 }
   0xb   :  { %p329_p6 = por %p328_p5, %p327_p4 }
   0xd   :  { %p330_p7 = pnand %p329_p6, %p323_p3 }
   0xf   :  { %333 = shalt.err (!%p330_p7)
}
  0x10   :  { %s361_s16 = smov 128   ;;  %s362_s17 = smov 8  }
  0x11   :  { %19 = dma.hbm_to_vmem [thread:$0]  %s503_s0, 2048, %s14_s7, [#allocation3], %s361_s16, %s361_s16, %s362_s17  }
  0x12   :  { %356 = dma.done.wait [#allocation3], 2048  }
  0x13   :  { %357 = vsyncadd [#allocation3], 4294965248  ;;  %v23_v0 = vld [vmem:[#allocation2] sm:$0xff]  ;;  %v24_v1 = vld [vmem:[#allocation2 + $0x8] sm:$0xff]  ;;  %v363_v28 = vmov -0.75   ;;  %s364_s0 = smov [#allocation5]  }
  0x14   :  { %v25_v2 = vld [vmem:[#allocation2 + $0x10] sm:$0xff]  ;;  %v26_v3 = vld [vmem:[#allocation2 + $0x18] sm:$0xff]  ;;  %v35_v4 = vand.u32 2147483647, %v23_v0  ;;  %v36_v5 = vand.u32 2147483647, %v24_v1 }
  0x15   :  { %v37_v6 = vand.u32 2147483647, %v25_v2  ;;  %v38_v7 = vand.u32 2147483647, %v26_v3  ;;  %vm31_vm0 = vcmp.lt.s32.totalorder %v23_v0, 0  ;;  %vm32_vm1 = vcmp.lt.s32.totalorder %v24_v1, 0 }
  0x16   :  { %v39_v8 = vsub.f32 1.0, %v35_v4  ;;  %v40_v9 = vsub.f32 1.0, %v36_v5  ;;  %vm33_vm2 = vcmp.lt.s32.totalorder %v25_v2, 0  ;;  %vm34_vm3 = vcmp.lt.s32.totalorder %v26_v3, 0  ;;  %v81_v13 = vld [vmem:[#allocation2 + $0x20] sm:$0xff]  ;;  %v82_v15 = vld [vmem:[#allocation2 + $0x28] sm:$0xff] }
  0x17   :  { %v41_v10 = vsub.f32 1.0, %v37_v6  ;;  %v42_v11 = vsub.f32 1.0, %v38_v7  ;;  %v83_v16 = vld [vmem:[#allocation2 + $0x30] sm:$0xff]  ;;  %v389_v17 = vld [vmem:[#allocation2 + $0x38] sm:$0xff]  ;;  %v93_v24 = vand.u32 2147483647, %v81_v13 }
  0x18   :  { %v43_v12 = vsel %vm31_vm0, %v35_v4, %v39_v8  ;;  %v44_v14 = vsel %vm32_vm1, %v36_v5, %v40_v9  ;;  %v94_v25 = vand.u32 2147483647, %v82_v15  ;;  %v95_v26 = vand.u32 2147483647, %v83_v16  ;;  %v139_v47 = vld [vmem:[#allocation2 + $0x40] sm:$0xff]  ;;  %v140_v48 = vld [vmem:[#allocation2 + $0x48] sm:$0xff] }
  0x19   :  { %v45_v18 = vsel %vm33_vm2, %v37_v6, %v41_v10  ;;  %v46_v19 = vsel %vm34_vm3, %v38_v7, %v42_v11  ;;  %v51_v20 = vsub.f32 1.0, %v43_v12  ;;  %v52_v21 = vsub.f32 1.0, %v44_v14  ;;  %v406_v49 = vld [vmem:[#allocation2 + $0x50] sm:$0xff]  ;;  %v412_v54 = vld [vmem:[#allocation2 + $0x58] sm:$0xff]  ;;  %s263_s20 = sshll.u32 %s364_s0, 4  ;;  %s264_s20 = int_to_ptr.vmem [resolvable:$true] %s263_s20 }
  0x1a   :  { %v53_v22 = vsub.f32 1.0, %v45_v18  ;;  %v54_v23 = vsub.f32 1.0, %v46_v19  ;;  %280 = vlog2.f32 %v43_v12  ;;  %v96_v27 = vand.u32 2147483647, %v389_v17  ;;  %s334_s21 = scalar_lea.vmem %s264_s20, 128  ;;  %p339_p9 = scmp.lt.s32.totalorder %s264_s20, %s264_s20 }
  0x1b   :  { %282 = vlog2.f32 %v44_v14  ;;  %v47_v29 = vsel %vm31_vm0, -0.25, %v363_v28  ;;  %v48_v30 = vsel %vm32_vm1, -0.25, %v363_v28  ;;  %v49_v31 = vsel %vm33_vm2, -0.25, %v363_v28  ;;  %p335_p8 = scmp.ne.s32.totalorder %s264_s20, %s334_s21  ;;  %p340_p10 = scmp.lt.s32.totalorder %s334_s21, %s334_s21 }
  0x1c   :  { %v50_v32 = vsel %vm34_vm3, -0.25, %v363_v28  ;;  %v55_v33 = vmul.f32 %v51_v20, %v51_v20  ;;  %v56_v34 = vmul.f32 %v52_v21, %v52_v21  ;;  %284 = vlog2.f32 %v45_v18 }
  0x1d   :  { %v57_v35 = vmul.f32 %v53_v22, %v53_v22  ;;  %v58_v36 = vmul.f32 %v54_v23, %v54_v23  ;;  %286 = vlog2.f32 %v46_v19  ;;  %v97_v37 = vsub.f32 1.0, %v93_v24  ;;  %p341_p11 = por %p340_p10, %p339_p9 }
  0x1e   :  { %vm89_vm4 = vcmp.lt.s32.totalorder %v81_v13, 0  ;;  %v98_v38 = vsub.f32 1.0, %v94_v25  ;;  %v99_v39 = vsub.f32 1.0, %v95_v26  ;;  %v100_v40 = vsub.f32 1.0, %v96_v27 }
  0x1f   :  { %vm90_vm5 = vcmp.lt.s32.totalorder %v82_v15, 0  ;;  %vm91_vm6 = vcmp.lt.s32.totalorder %v83_v16, 0  ;;  %vm92_vm7 = vcmp.lt.s32.totalorder %v389_v17, 0  ;;  %v59_v41 = vmul.f32 %v55_v33, %v47_v29  ;;  %p342_p12 = pnand %p341_p11, %p335_p8 }
  0x20   :  { %v60_v42 = vmul.f32 %v56_v34, %v48_v30  ;;  %v61_v43 = vmul.f32 %v57_v35, %v49_v31  ;;  %v403_v44 = vmul.f32 %v58_v36, %v50_v32  ;;  %v101_v45 = vsel %vm89_vm4, %v93_v24, %v97_v37  ;;  %v441_v31 = vld [vmem:[#allocation2 + $0x70] sm:$0xff]  ;;  %v443_v32 = vld [vmem:[#allocation2 + $0x78] sm:$0xff] }
  0x21   :  { %v105_v46 = vsel %vm89_vm4, -0.25, %v363_v28  ;;  %v102_v50 = vsel %vm90_vm5, %v94_v25, %v98_v38  ;;  %v103_v51 = vsel %vm91_vm6, %v95_v26, %v99_v39  ;;  %v104_v52 = vsel %vm92_vm7, %v96_v27, %v100_v40  ;;  %v431_v25 = vld [vmem:[#allocation2 + $0x60] sm:$0xff]  ;;  %v433_v26 = vld [vmem:[#allocation2 + $0x68] sm:$0xff] }
  0x22   :  { %v106_v53 = vsel %vm90_vm5, -0.25, %v363_v28  ;;  %v109_v56 = vsub.f32 1.0, %v101_v45  ;;  %v110_v57 = vsub.f32 1.0, %v102_v50  ;;  %v111_v58 = vsub.f32 1.0, %v103_v51 }
  0x23   :  { %v112_v59 = vsub.f32 1.0, %v104_v52  ;;  %288 = vlog2.f32 %v101_v45  ;;  %v151_v61 = vand.u32 2147483647, %v139_v47  ;;  %v152_v62 = vand.u32 2147483647, %v140_v48 }
  0x24   :  { %v281_v55 = vpop.eup %280  ;;  %v153_v63 = vand.u32 2147483647, %v406_v49  ;;  %v107_v0 = vsel %vm91_vm6, -0.25, %v363_v28  ;;  %290 = vlog2.f32 %v102_v50  ;;  %vm147_vm8 = vcmp.lt.s32.totalorder %v139_v47, 0 }
  0x25   :  { %v283_v60 = vpop.eup %282  ;;  %v154_v1 = vand.u32 2147483647, %v412_v54  ;;  %v64_v3 = vmul.f32 0.6931472, %v281_v55  ;;  %vm148_vm9 = vcmp.lt.s32.totalorder %v140_v48, 0  ;;  %v155_v4 = vsub.f32 1.0, %v151_v61 }
  0x26   :  { %v285_v2 = vpop.eup %284  ;;  %v156_v5 = vsub.f32 1.0, %v152_v62  ;;  %v66_v7 = vmul.f32 0.6931472, %v283_v60  ;;  %v113_v8 = vmul.f32 %v109_v56, %v109_v56  ;;  %v114_v9 = vmul.f32 %v110_v57, %v110_v57 }
  0x27   :  { %v287_v6 = vpop.eup %286  ;;  %292 = vlog2.f32 %v103_v51  ;;  %v115_v10 = vmul.f32 %v111_v58, %v111_v58  ;;  %v116_v11 = vmul.f32 %v112_v59, %v112_v59  ;;  %v157_v12 = vsub.f32 1.0, %v153_v63 }
  0x28   :  { %v159_v13 = vsel %vm147_vm8, %v151_v61, %v155_v4  ;;  %v68_v14 = vmul.f32 0.6931472, %v285_v2  ;;  %vm149_vm10 = vcmp.lt.s32.totalorder %v406_v49, 0  ;;  %v158_v15 = vsub.f32 1.0, %v154_v1 }
  0x29   :  { %v160_v16 = vsel %vm148_vm9, %v152_v62, %v156_v5  ;;  %v70_v18 = vmul.f32 0.6931472, %v287_v6  ;;  %v108_v19 = vsel %vm92_vm7, -0.25, %v363_v28  ;;  %294 = vlog2.f32 %v104_v52 }
  0x2a   :  { %vm150_vm11 = vcmp.lt.s32.totalorder %v412_v54, 0  ;;  %v425_v20 = vmul.f32 %v64_v3, %v59_v41  ;;  %v117_v21 = vmul.f32 %v113_v8, %v105_v46  ;;  %296 = vlog2.f32 %v159_v13 }
  0x2b   :  { %v427_v22 = vmul.f32 %v66_v7, %v60_v42  ;;  %v118_v23 = vmul.f32 %v114_v9, %v106_v53  ;;  %v161_v24 = vsel %vm149_vm10, %v153_v63, %v157_v12  ;;  %298 = vlog2.f32 %v160_v16 }
  0x2c   :  { %v435_v17 = vmul.f32 %v68_v14, %v61_v43  ;;  %v119_v27 = vmul.f32 %v115_v10, %v107_v0  ;;  %v437_v29 = vmul.f32 %v116_v11, %v108_v19  ;;  %v162_v30 = vsel %vm150_vm11, %v154_v1, %v158_v15 }
  0x2d   :  { %v289_v33 = vpop.eup %288  ;;  %v446_v34 = vmul.f32 %v70_v18, %v403_v44  ;;  %v163_v35 = vsel %vm147_vm8, -0.25, %v363_v28  ;;  %v164_v36 = vsel %vm148_vm9, -0.25, %v363_v28  ;;  %vm205_vm12 = vcmp.lt.s32.totalorder %v431_v25, 0 }
  0x2e   :  { %v291_v37 = vpop.eup %290  ;;  %300 = vlog2.f32 %v161_v24  ;;  %vm206_vm13 = vcmp.lt.s32.totalorder %v433_v26, 0  ;;  %v209_v38 = vand.u32 2147483647, %v431_v25  ;;  %v210_v39 = vand.u32 2147483647, %v433_v26 }
  0x2f   :  { %v167_v40 = vsub.f32 1.0, %v159_v13  ;;  %302 = vlog2.f32 %v162_v30  ;;  %v211_v41 = vand.u32 2147483647, %v441_v31  ;;  %v212_v42 = vand.u32 2147483647, %v443_v32 }
  0x30   :  { %v168_v44 = vsub.f32 1.0, %v160_v16  ;;  %vm207_vm14 = vcmp.lt.s32.totalorder %v441_v31, 0  ;;  %v213_v45 = vsub.f32 1.0, %v209_v38  ;;  %v214_v46 = vsub.f32 1.0, %v210_v39 }
  0x31   :  { %v293_v43 = vpop.eup %292  ;;  %v122_v47 = vmul.f32 0.6931472, %v289_v33  ;;  %v124_v48 = vmul.f32 0.6931472, %v291_v37  ;;  %v169_v50 = vsub.f32 1.0, %v161_v24  ;;  %v215_v51 = vsub.f32 1.0, %v211_v41 }
  0x32   :  { %v170_v52 = vsub.f32 1.0, %v162_v30  ;;  %v216_v53 = vsub.f32 1.0, %v212_v42  ;;  %v217_v55 = vsel %vm205_vm12, %v209_v38, %v213_v45  ;;  %v218_v56 = vsel %vm206_vm13, %v210_v39, %v214_v46 }
  0x33   :  { %v295_v57 = vpop.eup %294  ;;  %v126_v58 = vmul.f32 0.6931472, %v293_v43  ;;  %v165_v59 = vsel %vm149_vm10, -0.25, %v363_v28  ;;  %v171_v60 = vmul.f32 %v167_v40, %v167_v40  ;;  %vm208_vm15 = vcmp.lt.s32.totalorder %v443_v32, 0 }
  0x34   :  { %v297_v61 = vpop.eup %296  ;;  %v166_v62 = vsel %vm150_vm11, -0.25, %v363_v28  ;;  %v172_v63 = vmul.f32 %v168_v44, %v168_v44  ;;  %v219_v0 = vsel %vm207_vm14, %v211_v41, %v215_v51  ;;  %304 = vlog2.f32 %v217_v55 }
  0x35   :  { %v299_v1 = vpop.eup %298  ;;  %v129_v2 = vmul.f32 %v122_v47, %v117_v21  ;;  %v173_v3 = vmul.f32 %v169_v50, %v169_v50  ;;  %v225_v4 = vsub.f32 1.0, %v217_v55  ;;  %306 = vlog2.f32 %v218_v56 }
  0x36   :  { %v130_v49 = vmul.f32 %v124_v48, %v118_v23  ;;  %v174_v5 = vmul.f32 %v170_v52, %v170_v52  ;;  %v220_v6 = vsel %vm208_vm15, %v212_v42, %v216_v53  ;;  %v226_v7 = vsub.f32 1.0, %v218_v56 }
  0x37   :  { %v128_v8 = vmul.f32 0.6931472, %v295_v57  ;;  %v131_v9 = vmul.f32 %v126_v58, %v119_v27  ;;  %v175_v54 = vmul.f32 %v171_v60, %v163_v35  ;;  %308 = vlog2.f32 %v219_v0 }
  0x38   :  { %v301_v10 = vpop.eup %300  ;;  %v176_v11 = vmul.f32 %v172_v63, %v164_v36  ;;  %v180_v12 = vmul.f32 0.6931472, %v297_v61  ;;  %v182_v13 = vmul.f32 0.6931472, %v299_v1  ;;  %v227_v14 = vsub.f32 1.0, %v219_v0 }
  0x39   :  { %v303_v15 = vpop.eup %302  ;;  %v133_v16 = vadd.f32 %v129_v2, %v425_v20  ;;  %v177_v18 = vmul.f32 %v173_v3, %v165_v59  ;;  %v229_v19 = vmul.f32 %v225_v4, %v225_v4  ;;  %310 = vlog2.f32 %v220_v6 }
  0x3a   :  { %v184_v21 = vmul.f32 0.6931472, %v301_v10  ;;  %v221_v23 = vsel %vm205_vm12, -0.25, %v363_v28  ;;  %v228_v24 = vsub.f32 1.0, %v220_v6  ;;  %v230_v27 = vmul.f32 %v226_v7, %v226_v7 }
  0x3b   :  { %v132_v30 = vmul.f32 %v128_v8, %v437_v29  ;;  %v178_v33 = vmul.f32 %v174_v5, %v166_v62  ;;  %v186_v35 = vmul.f32 0.6931472, %v303_v15  ;;  %v222_v36 = vsel %vm206_vm13, -0.25, %v363_v28 }
  0x3c   :  { %v134_v20 = vadd.f32 %v130_v49, %v427_v22  ;;  %v187_v37 = vmul.f32 %v180_v12, %v175_v54  ;;  %v188_v38 = vmul.f32 %v182_v13, %v176_v11  ;;  %v231_v39 = vmul.f32 %v227_v14, %v227_v14 }
  0x3d   :  { %v223_v25 = vsel %vm207_vm14, -0.25, %v363_v28  ;;  %v233_v40 = vmul.f32 %v229_v19, %v221_v23  ;;  %v135_v42 = vadd.f32 %v131_v9, %v435_v17  ;;  %v189_v29 = vmul.f32 %v184_v21, %v177_v18 }
  0x3e   :  { %v305_v41 = vpop.eup %304  ;;  %v232_v43 = vmul.f32 %v228_v24, %v228_v24  ;;  %v234_v44 = vmul.f32 %v230_v27, %v222_v36  ;;  %v136_v26 = vadd.f32 %v132_v30, %v446_v34  ;;  %v190_v46 = vmul.f32 %v186_v35, %v178_v33 }
  0x3f   :  { %v307_v45 = vpop.eup %306  ;;  %v224_v22 = vsel %vm208_vm15, -0.25, %v363_v28  ;;  %v238_v47 = vmul.f32 0.6931472, %v305_v41  ;;  %v191_v48 = vadd.f32 %v187_v37, %v133_v16  ;;  %v192_v50 = vadd.f32 %v188_v38, %v134_v20 }
  0x40   :  { %v235_v31 = vmul.f32 %v231_v39, %v223_v25  ;;  %v240_v51 = vmul.f32 0.6931472, %v307_v45  ;;  %v193_v55 = vadd.f32 %v189_v29, %v135_v42  ;;  %v236_v17 = vmul.f32 %v232_v43, %v224_v22 }
  0x41   :  { %v309_v52 = vpop.eup %308  ;;  %v245_v53 = vmul.f32 %v238_v47, %v233_v40  ;;  %v194_v59 = vadd.f32 %v190_v46, %v136_v26 }
  0x42   :  { %v242_v56 = vmul.f32 0.6931472, %v309_v52  ;;  %v246_v57 = vmul.f32 %v240_v51, %v234_v44 }
  0x43   :  { %v311_v58 = vpop.eup %310  ;;  %v249_v61 = vadd.f32 %v245_v53, %v191_v48 }
  0x44   :  { %v244_v60 = vmul.f32 0.6931472, %v311_v58  ;;  %v247_v34 = vmul.f32 %v242_v56, %v235_v31  ;;  %v250_v62 = vadd.f32 %v246_v57, %v192_v50 }
  0x46   :  { %v248_v63 = vmul.f32 %v244_v60, %v236_v17  ;;  %v251_v32 = vadd.f32 %v247_v34, %v193_v55  ;;  %v253_v0 = vadd.f32 %v250_v62, %v249_v61 }
  0x48   :  { %v252_v28 = vadd.f32 %v248_v63, %v194_v59 }
  0x4a   :  { %v254_v1 = vadd.f32 %v252_v28, %v251_v32 }
  0x4c   :  { %v255_v2 = vadd.f32 %v254_v1, %v253_v0 }
  0x4e   :  { %256 = vst [vmem:[#allocation5] sm:$0xff] %v255_v2 }
  0x4f   :  { %345 = shalt.err (!%p342_p12)
}
  0x50   :  { %s346_s24 = scalar_lea.hbm %s504_s1, 128 }
  0x51   :  { %p347_p13 = scmp.ne.s32.totalorder %s504_s1, %s346_s24  ;;  %p350_p0 = scmp.lt.u32.totalorder %s346_s24, %s504_s1 }
  0x53   :  { %p352_p1 = pnand %p350_p0, %p347_p13 }
  0x55   :  { %355 = shalt.err (!%p352_p1)
}
  0x56   :  { %266 = dma.vmem_to_hbm [thread:$0]  %s264_s20, 128, %s504_s1, [#allocation4]  }
  0x57   :  { %358 = dma.done.wait [#allocation4], 128  }
  0x58   :  { %359 = vsyncadd [#allocation4], 4294967168 }
  0x59   :  { %270 = vsyncpa [#allocation3], 1 }
  0x5a   :  { %271 = vsyncpa [#allocation4], 1 }

</bundles_post_ra>
